<compile_context>
chip_gen: v5e
topology: v5e:2x2
jax: 0.10.0
libtpu: 0.0.40
codegen_flags: <defaults>
</compile_context>

<pallas_src>
import math
from functools import partial

import jax
import jax.numpy as jnp
from jax import lax
from jax.experimental import pallas as pl
from jax.experimental.pallas import tpu as pltpu

BN_EPS = 1e-5


# ------------------------------------------------------------------ #
# Fused decoder-block kernel (one grid step == one image)
# ------------------------------------------------------------------ #
def _decoder_block_kernel(x_ref, w1_ref, w2_ref, w3_ref, t1_ref, t2_ref, t3_ref,
                          out_ref, y1pad_ref, *, H, W):
    """Refs (per grid step, all f32):
      x_ref   : (1, Cin, H*W)      input image, channels-on-sublanes / pixels-on-lanes
      w1_ref  : (mid, Cin)         conv1 weight, BN scale folded in
      w2_ref  : (9, mid, mid)      deconv tap matrices (co, ci), k = kh*3 + kw, scale folded
      w3_ref  : (Cout, mid)        conv3 weight, BN scale folded in
      t*_ref  : (C, 1)             folded bias+BN shift per layer
      out_ref : (1, 4, Cout, H*W)  phase-major output, phase = 2*r + s
      y1pad_ref: (mid, H*W + 128)  scratch: y1 followed by a zero tail (shifted reads)
    """
    HW = H * W
    mid = w1_ref.shape[0]
    tail = y1pad_ref.shape[1] - HW

    def mm(a, b):
        return jnp.dot(a, b, preferred_element_type=jnp.float32)

    # ---- conv1 (1x1) + BN + ReLU : (mid, Cin) @ (Cin, HW) ----
    y1 = jnp.maximum(mm(w1_ref[...], x_ref[0]) + t1_ref[...], 0.0)      # (mid, HW)

    # ---- shifted views of y1 for the 4-phase sub-pixel ConvTranspose ----
    # Zero tail handles reads past the last row; a column mask handles the
    # within-row wrap-around of the +1 column shift.
    y1pad_ref[:, pl.ds(HW, tail)] = jnp.zeros((mid, tail), jnp.float32)
    y1pad_ref[:, pl.ds(0, HW)] = y1
    y_01 = y1pad_ref[:, pl.ds(1, HW)]        # Y1[a, b+1]
    y_10 = y1pad_ref[:, pl.ds(W, HW)]        # Y1[a+1, b]
    y_11 = y1pad_ref[:, pl.ds(W + 1, HW)]    # Y1[a+1, b+1]
    col = lax.broadcasted_iota(jnp.int32, (mid, HW), 1) % W
    not_last_col = col < (W - 1)
    y_01 = jnp.where(not_last_col, y_01, 0.0)
    y_11 = jnp.where(not_last_col, y_11, 0.0)

    # ---- deconv2 (stride-2 ConvTranspose) as 4 phases + BN + ReLU ----
    # output[2a+r, 2b+s] gets taps (kh,kw) with ih = a + (1 - kh//? ...) derived from
    # oh = 2*ih - 1 + kh  =>  even rows use kh=1, odd rows use kh=0 (ih=a+1) and kh=2 (ih=a).
    t2b = t2_ref[...]
    p00 = mm(w2_ref[4], y1)                                             # (1,1)
    p01 = mm(w2_ref[3], y_01) + mm(w2_ref[5], y1)                       # (1,0),(1,2)
    p10 = mm(w2_ref[1], y_10) + mm(w2_ref[7], y1)                       # (0,1),(2,1)
    p11 = (mm(w2_ref[0], y_11) + mm(w2_ref[2], y_10)
           + mm(w2_ref[6], y_01) + mm(w2_ref[8], y1))                   # (0,0),(0,2),(2,0),(2,2)
    p00 = jnp.maximum(p00 + t2b, 0.0)
    p01 = jnp.maximum(p01 + t2b, 0.0)
    p10 = jnp.maximum(p10 + t2b, 0.0)
    p11 = jnp.maximum(p11 + t2b, 0.0)

    # ---- conv3 (1x1) + BN + ReLU per phase; lane-dense (Cout, HW) stores ----
    w3 = w3_ref[...]
    t3b = t3_ref[...]
    out_ref[0, 0] = jnp.maximum(mm(w3, p00) + t3b, 0.0)
    out_ref[0, 1] = jnp.maximum(mm(w3, p01) + t3b, 0.0)
    out_ref[0, 2] = jnp.maximum(mm(w3, p10) + t3b, 0.0)
    out_ref[0, 3] = jnp.maximum(mm(w3, p11) + t3b, 0.0)


def fold_bias_bn(bias, bn):
    """Fold conv bias + inference-mode BatchNorm into (scale, shift)."""
    s = bn["gamma"] / jnp.sqrt(bn["var"] + BN_EPS)
    t = bn["beta"] + s * (bias - bn["mean"])
    return s, t


def decoder_block_forward(params, x):
    """x: (N, Cin, H, W) f32 NCHW -> (N, n_filters, 2H, 2W) f32 NCHW."""
    p = params
    N, Cin, H, W = x.shape
    mid = p["conv1_w"].shape[0]
    Cout = p["conv3_w"].shape[0]
    HW = H * W
    PAD = 128  # zero tail for shifted-window reads (>= W+1, keeps scratch lane-aligned)

    # ---- fold bias + BN into weights / shifts (tiny one-time XLA ops) ----
    s1, t1 = fold_bias_bn(p["conv1_b"], p["bn1"])
    s2, t2 = fold_bias_bn(p["deconv2_b"], p["bn2"])
    s3, t3 = fold_bias_bn(p["conv3_b"], p["bn3"])

    w1s = p["conv1_w"].reshape(mid, Cin) * s1[:, None]
    # ConvTranspose weight (Cin=mid, Cout=mid, 3, 3) -> 9 tap matrices (co, ci), k = kh*3+kw.
    w2s = jnp.transpose(p["deconv2_w"], (2, 3, 1, 0)).reshape(9, mid, mid) * s2[None, :, None]
    w3s = p["conv3_w"].reshape(Cout, mid) * s3[:, None]
    t1c = t1.reshape(mid, 1)
    t2c = t2.reshape(mid, 1)
    t3c = t3.reshape(Cout, 1)

    x_flat = x.reshape(N, Cin, HW)  # free reshape: channels -> sublanes, pixels -> lanes

    out5 = pl.pallas_call(
        partial(_decoder_block_kernel, H=H, W=W),
        out_shape=jax.ShapeDtypeStruct((N, 4, Cout, HW), jnp.float32),
        grid_spec=pltpu.PrefetchScalarGridSpec(
            num_scalar_prefetch=0,
            grid=(N,),
            in_specs=[
                pl.BlockSpec((1, Cin, HW), lambda n: (n, 0, 0)),
                pl.BlockSpec((mid, Cin), lambda n: (0, 0)),
                pl.BlockSpec((9, mid, mid), lambda n: (0, 0, 0)),
                pl.BlockSpec((Cout, mid), lambda n: (0, 0)),
                pl.BlockSpec((mid, 1), lambda n: (0, 0)),
                pl.BlockSpec((mid, 1), lambda n: (0, 0)),
                pl.BlockSpec((Cout, 1), lambda n: (0, 0)),
            ],
            out_specs=pl.BlockSpec((1, 4, Cout, HW), lambda n: (n, 0, 0, 0)),
            scratch_shapes=[pltpu.VMEM((mid, HW + PAD), jnp.float32)],
        ),
        compiler_params=pltpu.CompilerParams(
            dimension_semantics=("parallel",),
        ),
        cost_estimate=pl.CostEstimate(
            flops=2 * N * HW * (Cin * mid + 9 * mid * mid + 4 * mid * Cout),
            transcendentals=0,
            bytes_accessed=4 * (N * Cin * HW + N * 4 * Cout * HW
                                + mid * Cin + 9 * mid * mid + Cout * mid
                                + 2 * mid + Cout),
        ),
    )(x_flat, w1s, w2s, w3s, t1c, t2c, t3c)

    # (N, phase=2x2, Cout, H*W) -> NCHW (N, Cout, 2H, 2W): interleave the sub-pixel phases.
    # TODO(synk): this single wrapper-side transpose stands in for an in-kernel strided
    #             scatter (stride-2 stores in both spatial dims would force masked stores).
    out = out5.reshape(N, 2, 2, Cout, H, W)
    out = jnp.transpose(out, (0, 3, 4, 1, 5, 2)).reshape(N, Cout, 2 * H, 2 * W)
    return out


# ------------------------------------------------------------------ #
# Parameters (deterministic, synthetic)
# ------------------------------------------------------------------ #
def init_bn(key, c):
    k1, k2, k3, k4 = jax.random.split(key, 4)
    return {
        "gamma": 1.0 + 0.2 * jax.random.normal(k1, (c,), jnp.float32),
        "beta": 0.1 * jax.random.normal(k2, (c,), jnp.float32),
        "mean": 0.1 * jax.random.normal(k3, (c,), jnp.float32),
        "var": 1.0 + 0.2 * jax.random.uniform(k4, (c,), jnp.float32),
    }


def conv_weight(key, shape, fan_in):
    return jax.random.normal(key, shape, jnp.float32) * math.sqrt(2.0 / fan_in)


def init_params(key, in_channels, n_filters):
    mid = in_channels // 4
    ks = jax.random.split(key, 9)
    return {
        "conv1_w": conv_weight(ks[0], (mid, in_channels, 1, 1), in_channels),
        "conv1_b": 0.1 * jax.random.normal(ks[1], (mid,), jnp.float32),
        "bn1": init_bn(ks[2], mid),
        # PyTorch ConvTranspose2d weight layout: (in, out, kh, kw)
        "deconv2_w": conv_weight(ks[3], (mid, mid, 3, 3), mid * 9),
        "deconv2_b": 0.1 * jax.random.normal(ks[4], (mid,), jnp.float32),
        "bn2": init_bn(ks[5], mid),
        "conv3_w": conv_weight(ks[6], (n_filters, mid, 1, 1), mid),
        "conv3_b": 0.1 * jax.random.normal(ks[7], (n_filters,), jnp.float32),
        "bn3": init_bn(ks[8], n_filters),
    }


# ------------------------------------------------------------------ #
# Pure-JAX (XLA) reference for correctness checking
# ------------------------------------------------------------------ #
def reference_forward(params, x):
    p = params

    def bn_apply(y, bnp):
        s = bnp["gamma"] / jnp.sqrt(bnp["var"] + BN_EPS)
        sh = bnp["beta"] - bnp["mean"] * s
        return y * s[None, :, None, None] + sh[None, :, None, None]

    dn = ("NCHW", "OIHW", "NCHW")
    y = lax.conv_general_dilated(x, p["conv1_w"], (1, 1), "VALID",
                                 dimension_numbers=dn)
    y = y + p["conv1_b"][None, :, None, None]
    y = jnp.maximum(bn_apply(y, p["bn1"]), 0.0)

    w_eq = jnp.transpose(p["deconv2_w"][:, :, ::-1, ::-1], (1, 0, 2, 3))
    y = lax.conv_general_dilated(y, w_eq, (1, 1), ((1, 2), (1, 2)),
                                 lhs_dilation=(2, 2), dimension_numbers=dn)
    y = y + p["deconv2_b"][None, :, None, None]
    y = jnp.maximum(bn_apply(y, p["bn2"]), 0.0)

    y = lax.conv_general_dilated(y, p["conv3_w"], (1, 1), "VALID",
                                 dimension_numbers=dn)
    y = y + p["conv3_b"][None, :, None, None]
    y = jnp.maximum(bn_apply(y, p["bn3"]), 0.0)
    return y


# ------------------------------------------------------------------ #
if __name__ == "__main__":
    key = jax.random.PRNGKey(0)
    kp, kx = jax.random.split(key)

    in_channels, n_filters = 64, 32
    N, H, W = 2, 16, 16

    params = init_params(kp, in_channels, n_filters)
    x = jax.random.normal(kx, (N, in_channels, H, W), jnp.float32)

    fwd = jax.jit(decoder_block_forward)
    out = jax.block_until_ready(fwd(params, x))
    assert out.shape == (N, n_filters, 2 * H, 2 * W), out.shape
    assert bool(jnp.all(jnp.isfinite(out)))

    # correctness vs XLA reference
    ref = jax.block_until_ready(reference_forward(params, x))
    rel_err = float(jnp.max(jnp.abs(out - ref)) / (jnp.max(jnp.abs(ref)) + 1e-6))
    assert rel_err < 0.05, f"relative error too large: {rel_err}"

    print("KERNEL_OK")
</pallas_src>

<mosaic_0001>
module attributes {stable_mosaic.version = 11 : i64} {
  func.func @_decoder_block_kernel(%arg0: i32, %arg1: memref<1x64x256xf32, #tpu.memory_space<vmem>>, %arg2: memref<16x64xf32, #tpu.memory_space<vmem>>, %arg3: memref<9x16x16xf32, #tpu.memory_space<vmem>>, %arg4: memref<32x16xf32, #tpu.memory_space<vmem>>, %arg5: memref<16x1xf32, #tpu.memory_space<vmem>>, %arg6: memref<16x1xf32, #tpu.memory_space<vmem>>, %arg7: memref<32x1xf32, #tpu.memory_space<vmem>>, %arg8: memref<1x4x32x256xf32, #tpu.memory_space<vmem>>, %arg9: memref<16x384xf32, #tpu.memory_space<vmem>>) attributes {dimension_semantics = [#tpu.dimension_semantics<parallel>], iteration_bounds = array<i64: 2>, scalar_prefetch = 0 : i64, scratch_operands = 1 : i64, tpu.core_type = #tpu.core_type<tc>, window_params = [{transform_indices = @transform_0, window_bounds = array<i64: 1, 64, 256>}, {pipeline_mode = #tpu.pipeline_mode<synchronous>, transform_indices = @transform_1, window_bounds = array<i64: 16, 64>}, {pipeline_mode = #tpu.pipeline_mode<synchronous>, transform_indices = @transform_2, window_bounds = array<i64: 9, 16, 16>}, {pipeline_mode = #tpu.pipeline_mode<synchronous>, transform_indices = @transform_3, window_bounds = array<i64: 32, 16>}, {pipeline_mode = #tpu.pipeline_mode<synchronous>, transform_indices = @transform_4, window_bounds = array<i64: 16, 1>}, {pipeline_mode = #tpu.pipeline_mode<synchronous>, transform_indices = @transform_5, window_bounds = array<i64: 16, 1>}, {pipeline_mode = #tpu.pipeline_mode<synchronous>, transform_indices = @transform_6, window_bounds = array<i64: 32, 1>}, {transform_indices = @transform_7, window_bounds = array<i64: 1, 4, 32, 256>}]} {
    %c0 = arith.constant 0 : index
    %c0_0 = arith.constant 0 : index
    %0 = vector.load %arg2[%c0, %c0_0] : memref<16x64xf32, #tpu.memory_space<vmem>>, vector<16x64xf32>
    %c0_1 = arith.constant 0 : index
    %c0_2 = arith.constant 0 : index
    %c0_3 = arith.constant 0 : index
    %1 = vector.load %arg1[%c0_1, %c0_2, %c0_3] : memref<1x64x256xf32, #tpu.memory_space<vmem>>, vector<1x64x256xf32>
    %2 = vector.shape_cast %1 : vector<1x64x256xf32> to vector<64x256xf32>
    %cst = arith.constant dense<0.000000e+00> : vector<16x256xf32>
    %3 = tpu.matmul %0, %2, %cst {dimension_numbers = #tpu.dot_dimension_numbers<[1], [0], [0], [1], [0, 0, 1, 1], [], []>} : vector<16x64xf32>, vector<64x256xf32>, vector<16x256xf32> -> vector<16x256xf32>
    %c0_4 = arith.constant 0 : index
    %c0_5 = arith.constant 0 : index
    %4 = vector.load %arg5[%c0_4, %c0_5] : memref<16x1xf32, #tpu.memory_space<vmem>>, vector<16x1xf32>
    %5 = vector.broadcast %4 : vector<16x1xf32> to vector<16x256xf32>
    %6 = arith.addf %3, %5 : vector<16x256xf32>
    %cst_6 = arith.constant 0.000000e+00 : f32
    %7 = vector.broadcast %cst_6 : f32 to vector<16x256xf32>
    %8 = arith.maximumf %6, %7 : vector<16x256xf32>
    %cst_7 = arith.constant 0.000000e+00 : f32
    %9 = vector.broadcast %cst_7 : f32 to vector<16x128xf32>
    %c0_8 = arith.constant 0 : index
    %c256 = arith.constant 256 : index
    %10 = vector.load %arg9[%c0_8, %c256] : memref<16x384xf32, #tpu.memory_space<vmem>>, vector<16x128xf32>
    tpu.vector_store %arg9[%c0_8, %c256], %9 {strides = array<i32>} : memref<16x384xf32, #tpu.memory_space<vmem>>, vector<16x128xf32>,
    %c0_9 = arith.constant 0 : index
    %c0_10 = arith.constant 0 : index
    %11 = vector.load %arg9[%c0_9, %c0_10] : memref<16x384xf32, #tpu.memory_space<vmem>>, vector<16x256xf32>
    tpu.vector_store %arg9[%c0_9, %c0_10], %8 {strides = array<i32>} : memref<16x384xf32, #tpu.memory_space<vmem>>, vector<16x256xf32>,
    %c0_11 = arith.constant 0 : index
    %c1 = arith.constant 1 : index
    %12 = vector.load %arg9[%c0_11, %c1] : memref<16x384xf32, #tpu.memory_space<vmem>>, vector<16x256xf32>
    %c0_12 = arith.constant 0 : index
    %c16 = arith.constant 16 : index
    %13 = vector.load %arg9[%c0_12, %c16] : memref<16x384xf32, #tpu.memory_space<vmem>>, vector<16x256xf32>
    %c0_13 = arith.constant 0 : index
    %c17 = arith.constant 17 : index
    %14 = vector.load %arg9[%c0_13, %c17] : memref<16x384xf32, #tpu.memory_space<vmem>>, vector<16x256xf32>
    %15 = tpu.iota {dimensions = array<i32: 1>} : vector<16x256xi32>
    %c16_i32 = arith.constant 16 : i32
    %c0_i32 = arith.constant 0 : i32
    %16 = arith.cmpi eq, %c16_i32, %c0_i32 : i32
    %c1_i32 = arith.constant 1 : i32
    %17 = arith.select %16, %c1_i32, %c16_i32 : i32
    %18 = vector.broadcast %17 : i32 to vector<16x256xi32>
    %19 = arith.remsi %15, %18 : vector<16x256xi32>
    %c0_i32_14 = arith.constant 0 : i32
    %20 = vector.broadcast %c0_i32_14 : i32 to vector<16x256xi32>
    %21 = arith.cmpi ne, %19, %20 : vector<16x256xi32>
    %c0_i32_15 = arith.constant 0 : i32
    %22 = vector.broadcast %c0_i32_15 : i32 to vector<16x256xi32>
    %23 = arith.cmpi slt, %19, %22 : vector<16x256xi32>
    %c0_i32_16 = arith.constant 0 : i32
    %24 = arith.cmpi slt, %17, %c0_i32_16 : i32
    %25 = vector.broadcast %24 : i1 to vector<16x256xi1>
    %26 = vector.broadcast %25 : vector<16x256xi1> to vector<16x256xi1>
    %27 = arith.xori %23, %26 : vector<16x256xi1>
    %28 = arith.andi %27, %21 : vector<16x256xi1>
    %29 = vector.broadcast %17 : i32 to vector<16x256xi32>
    %30 = arith.addi %19, %29 : vector<16x256xi32>
    %31 = arith.select %28, %30, %19 : vector<16x256xi1>, vector<16x256xi32>
    %c15_i32 = arith.constant 15 : i32
    %32 = vector.broadcast %c15_i32 : i32 to vector<16x256xi32>
    %33 = arith.cmpi slt, %31, %32 : vector<16x256xi32>
    %cst_17 = arith.constant 0.000000e+00 : f32
    %34 = vector.broadcast %cst_17 : f32 to vector<16x256xf32>
    %35 = arith.select %33, %12, %34 : vector<16x256xi1>, vector<16x256xf32>
    %cst_18 = arith.constant 0.000000e+00 : f32
    %36 = vector.broadcast %cst_18 : f32 to vector<16x256xf32>
    %37 = arith.select %33, %14, %36 : vector<16x256xi1>, vector<16x256xf32>
    %c0_19 = arith.constant 0 : index
    %c0_20 = arith.constant 0 : index
    %38 = vector.load %arg6[%c0_19, %c0_20] : memref<16x1xf32, #tpu.memory_space<vmem>>, vector<16x1xf32>
    %c4 = arith.constant 4 : index
    %c0_21 = arith.constant 0 : index
    %c0_22 = arith.constant 0 : index
    %39 = vector.load %arg3[%c4, %c0_21, %c0_22] : memref<9x16x16xf32, #tpu.memory_space<vmem>>, vector<1x16x16xf32>
    %40 = vector.shape_cast %39 : vector<1x16x16xf32> to vector<16x16xf32>
    %cst_23 = arith.constant dense<0.000000e+00> : vector<16x256xf32>
    %41 = tpu.matmul %40, %8, %cst_23 {dimension_numbers = #tpu.dot_dimension_numbers<[1], [0], [0], [1], [0, 0, 1, 1], [], []>} : vector<16x16xf32>, vector<16x256xf32>, vector<16x256xf32> -> vector<16x256xf32>
    %c3 = arith.constant 3 : index
    %c0_24 = arith.constant 0 : index
    %c0_25 = arith.constant 0 : index
    %42 = vector.load %arg3[%c3, %c0_24, %c0_25] : memref<9x16x16xf32, #tpu.memory_space<vmem>>, vector<1x16x16xf32>
    %43 = vector.shape_cast %42 : vector<1x16x16xf32> to vector<16x16xf32>
    %cst_26 = arith.constant dense<0.000000e+00> : vector<16x256xf32>
    %44 = tpu.matmul %43, %35, %cst_26 {dimension_numbers = #tpu.dot_dimension_numbers<[1], [0], [0], [1], [0, 0, 1, 1], [], []>} : vector<16x16xf32>, vector<16x256xf32>, vector<16x256xf32> -> vector<16x256xf32>
    %c5 = arith.constant 5 : index
    %c0_27 = arith.constant 0 : index
    %c0_28 = arith.constant 0 : index
    %45 = vector.load %arg3[%c5, %c0_27, %c0_28] : memref<9x16x16xf32, #tpu.memory_space<vmem>>, vector<1x16x16xf32>
    %46 = vector.shape_cast %45 : vector<1x16x16xf32> to vector<16x16xf32>
    %cst_29 = arith.constant dense<0.000000e+00> : vector<16x256xf32>
    %47 = tpu.matmul %46, %8, %cst_29 {dimension_numbers = #tpu.dot_dimension_numbers<[1], [0], [0], [1], [0, 0, 1, 1], [], []>} : vector<16x16xf32>, vector<16x256xf32>, vector<16x256xf32> -> vector<16x256xf32>
    %48 = arith.addf %44, %47 : vector<16x256xf32>
    %c1_30 = arith.constant 1 : index
    %c0_31 = arith.constant 0 : index
    %c0_32 = arith.constant 0 : index
    %49 = vector.load %arg3[%c1_30, %c0_31, %c0_32] : memref<9x16x16xf32, #tpu.memory_space<vmem>>, vector<1x16x16xf32>
    %50 = vector.shape_cast %49 : vector<1x16x16xf32> to vector<16x16xf32>
    %cst_33 = arith.constant dense<0.000000e+00> : vector<16x256xf32>
    %51 = tpu.matmul %50, %13, %cst_33 {dimension_numbers = #tpu.dot_dimension_numbers<[1], [0], [0], [1], [0, 0, 1, 1], [], []>} : vector<16x16xf32>, vector<16x256xf32>, vector<16x256xf32> -> vector<16x256xf32>
    %c7 = arith.constant 7 : index
    %c0_34 = arith.constant 0 : index
    %c0_35 = arith.constant 0 : index
    %52 = vector.load %arg3[%c7, %c0_34, %c0_35] : memref<9x16x16xf32, #tpu.memory_space<vmem>>, vector<1x16x16xf32>
    %53 = vector.shape_cast %52 : vector<1x16x16xf32> to vector<16x16xf32>
    %cst_36 = arith.constant dense<0.000000e+00> : vector<16x256xf32>
    %54 = tpu.matmul %53, %8, %cst_36 {dimension_numbers = #tpu.dot_dimension_numbers<[1], [0], [0], [1], [0, 0, 1, 1], [], []>} : vector<16x16xf32>, vector<16x256xf32>, vector<16x256xf32> -> vector<16x256xf32>
    %55 = arith.addf %51, %54 : vector<16x256xf32>
    %c0_37 = arith.constant 0 : index
    %c0_38 = arith.constant 0 : index
    %c0_39 = arith.constant 0 : index
    %56 = vector.load %arg3[%c0_37, %c0_38, %c0_39] : memref<9x16x16xf32, #tpu.memory_space<vmem>>, vector<1x16x16xf32>
    %57 = vector.shape_cast %56 : vector<1x16x16xf32> to vector<16x16xf32>
    %cst_40 = arith.constant dense<0.000000e+00> : vector<16x256xf32>
    %58 = tpu.matmul %57, %37, %cst_40 {dimension_numbers = #tpu.dot_dimension_numbers<[1], [0], [0], [1], [0, 0, 1, 1], [], []>} : vector<16x16xf32>, vector<16x256xf32>, vector<16x256xf32> -> vector<16x256xf32>
    %c2 = arith.constant 2 : index
    %c0_41 = arith.constant 0 : index
    %c0_42 = arith.constant 0 : index
    %59 = vector.load %arg3[%c2, %c0_41, %c0_42] : memref<9x16x16xf32, #tpu.memory_space<vmem>>, vector<1x16x16xf32>
    %60 = vector.shape_cast %59 : vector<1x16x16xf32> to vector<16x16xf32>
    %cst_43 = arith.constant dense<0.000000e+00> : vector<16x256xf32>
    %61 = tpu.matmul %60, %13, %cst_43 {dimension_numbers = #tpu.dot_dimension_numbers<[1], [0], [0], [1], [0, 0, 1, 1], [], []>} : vector<16x16xf32>, vector<16x256xf32>, vector<16x256xf32> -> vector<16x256xf32>
    %62 = arith.addf %58, %61 : vector<16x256xf32>
    %c6 = arith.constant 6 : index
    %c0_44 = arith.constant 0 : index
    %c0_45 = arith.constant 0 : index
    %63 = vector.load %arg3[%c6, %c0_44, %c0_45] : memref<9x16x16xf32, #tpu.memory_space<vmem>>, vector<1x16x16xf32>
    %64 = vector.shape_cast %63 : vector<1x16x16xf32> to vector<16x16xf32>
    %cst_46 = arith.constant dense<0.000000e+00> : vector<16x256xf32>
    %65 = tpu.matmul %64, %35, %cst_46 {dimension_numbers = #tpu.dot_dimension_numbers<[1], [0], [0], [1], [0, 0, 1, 1], [], []>} : vector<16x16xf32>, vector<16x256xf32>, vector<16x256xf32> -> vector<16x256xf32>
    %66 = arith.addf %62, %65 : vector<16x256xf32>
    %c8 = arith.constant 8 : index
    %c0_47 = arith.constant 0 : index
    %c0_48 = arith.constant 0 : index
    %67 = vector.load %arg3[%c8, %c0_47, %c0_48] : memref<9x16x16xf32, #tpu.memory_space<vmem>>, vector<1x16x16xf32>
    %68 = vector.shape_cast %67 : vector<1x16x16xf32> to vector<16x16xf32>
    %cst_49 = arith.constant dense<0.000000e+00> : vector<16x256xf32>
    %69 = tpu.matmul %68, %8, %cst_49 {dimension_numbers = #tpu.dot_dimension_numbers<[1], [0], [0], [1], [0, 0, 1, 1], [], []>} : vector<16x16xf32>, vector<16x256xf32>, vector<16x256xf32> -> vector<16x256xf32>
    %70 = arith.addf %66, %69 : vector<16x256xf32>
    %71 = vector.broadcast %38 : vector<16x1xf32> to vector<16x256xf32>
    %72 = arith.addf %41, %71 : vector<16x256xf32>
    %cst_50 = arith.constant 0.000000e+00 : f32
    %73 = vector.broadcast %cst_50 : f32 to vector<16x256xf32>
    %74 = arith.maximumf %72, %73 : vector<16x256xf32>
    %75 = vector.broadcast %38 : vector<16x1xf32> to vector<16x256xf32>
    %76 = arith.addf %48, %75 : vector<16x256xf32>
    %cst_51 = arith.constant 0.000000e+00 : f32
    %77 = vector.broadcast %cst_51 : f32 to vector<16x256xf32>
    %78 = arith.maximumf %76, %77 : vector<16x256xf32>
    %79 = vector.broadcast %38 : vector<16x1xf32> to vector<16x256xf32>
    %80 = arith.addf %55, %79 : vector<16x256xf32>
    %cst_52 = arith.constant 0.000000e+00 : f32
    %81 = vector.broadcast %cst_52 : f32 to vector<16x256xf32>
    %82 = arith.maximumf %80, %81 : vector<16x256xf32>
    %83 = vector.broadcast %38 : vector<16x1xf32> to vector<16x256xf32>
    %84 = arith.addf %70, %83 : vector<16x256xf32>
    %cst_53 = arith.constant 0.000000e+00 : f32
    %85 = vector.broadcast %cst_53 : f32 to vector<16x256xf32>
    %86 = arith.maximumf %84, %85 : vector<16x256xf32>
    %c0_54 = arith.constant 0 : index
    %c0_55 = arith.constant 0 : index
    %87 = vector.load %arg4[%c0_54, %c0_55] : memref<32x16xf32, #tpu.memory_space<vmem>>, vector<32x16xf32>
    %c0_56 = arith.constant 0 : index
    %c0_57 = arith.constant 0 : index
    %88 = vector.load %arg7[%c0_56, %c0_57] : memref<32x1xf32, #tpu.memory_space<vmem>>, vector<32x1xf32>
    %cst_58 = arith.constant dense<0.000000e+00> : vector<32x256xf32>
    %89 = tpu.matmul %87, %74, %cst_58 {dimension_numbers = #tpu.dot_dimension_numbers<[1], [0], [0], [1], [0, 0, 1, 1], [], []>} : vector<32x16xf32>, vector<16x256xf32>, vector<32x256xf32> -> vector<32x256xf32>
    %90 = vector.broadcast %88 : vector<32x1xf32> to vector<32x256xf32>
    %91 = arith.addf %89, %90 : vector<32x256xf32>
    %cst_59 = arith.constant 0.000000e+00 : f32
    %92 = vector.broadcast %cst_59 : f32 to vector<32x256xf32>
    %93 = arith.maximumf %91, %92 : vector<32x256xf32>
    %c0_60 = arith.constant 0 : index
    %c0_61 = arith.constant 0 : index
    %c0_62 = arith.constant 0 : index
    %c0_63 = arith.constant 0 : index
    %94 = vector.load %arg8[%c0_60, %c0_61, %c0_62, %c0_63] : memref<1x4x32x256xf32, #tpu.memory_space<vmem>>, vector<1x1x32x256xf32>
    %95 = vector.shape_cast %94 : vector<1x1x32x256xf32> to vector<32x256xf32>
    %96 = vector.shape_cast %93 : vector<32x256xf32> to vector<1x1x32x256xf32>
    tpu.vector_store %arg8[%c0_60, %c0_61, %c0_62, %c0_63], %96 {strides = array<i32>} : memref<1x4x32x256xf32, #tpu.memory_space<vmem>>, vector<1x1x32x256xf32>,
    %cst_64 = arith.constant dense<0.000000e+00> : vector<32x256xf32>
    %97 = tpu.matmul %87, %78, %cst_64 {dimension_numbers = #tpu.dot_dimension_numbers<[1], [0], [0], [1], [0, 0, 1, 1], [], []>} : vector<32x16xf32>, vector<16x256xf32>, vector<32x256xf32> -> vector<32x256xf32>
    %98 = vector.broadcast %88 : vector<32x1xf32> to vector<32x256xf32>
    %99 = arith.addf %97, %98 : vector<32x256xf32>
    %cst_65 = arith.constant 0.000000e+00 : f32
    %100 = vector.broadcast %cst_65 : f32 to vector<32x256xf32>
    %101 = arith.maximumf %99, %100 : vector<32x256xf32>
    %c0_66 = arith.constant 0 : index
    %c1_67 = arith.constant 1 : index
    %c0_68 = arith.constant 0 : index
    %c0_69 = arith.constant 0 : index
    %102 = vector.load %arg8[%c0_66, %c1_67, %c0_68, %c0_69] : memref<1x4x32x256xf32, #tpu.memory_space<vmem>>, vector<1x1x32x256xf32>
    %103 = vector.shape_cast %102 : vector<1x1x32x256xf32> to vector<32x256xf32>
    %104 = vector.shape_cast %101 : vector<32x256xf32> to vector<1x1x32x256xf32>
    tpu.vector_store %arg8[%c0_66, %c1_67, %c0_68, %c0_69], %104 {strides = array<i32>} : memref<1x4x32x256xf32, #tpu.memory_space<vmem>>, vector<1x1x32x256xf32>,
    %cst_70 = arith.constant dense<0.000000e+00> : vector<32x256xf32>
    %105 = tpu.matmul %87, %82, %cst_70 {dimension_numbers = #tpu.dot_dimension_numbers<[1], [0], [0], [1], [0, 0, 1, 1], [], []>} : vector<32x16xf32>, vector<16x256xf32>, vector<32x256xf32> -> vector<32x256xf32>
    %106 = vector.broadcast %88 : vector<32x1xf32> to vector<32x256xf32>
    %107 = arith.addf %105, %106 : vector<32x256xf32>
    %cst_71 = arith.constant 0.000000e+00 : f32
    %108 = vector.broadcast %cst_71 : f32 to vector<32x256xf32>
    %109 = arith.maximumf %107, %108 : vector<32x256xf32>
    %c0_72 = arith.constant 0 : index
    %c2_73 = arith.constant 2 : index
    %c0_74 = arith.constant 0 : index
    %c0_75 = arith.constant 0 : index
    %110 = vector.load %arg8[%c0_72, %c2_73, %c0_74, %c0_75] : memref<1x4x32x256xf32, #tpu.memory_space<vmem>>, vector<1x1x32x256xf32>
    %111 = vector.shape_cast %110 : vector<1x1x32x256xf32> to vector<32x256xf32>
    %112 = vector.shape_cast %109 : vector<32x256xf32> to vector<1x1x32x256xf32>
    tpu.vector_store %arg8[%c0_72, %c2_73, %c0_74, %c0_75], %112 {strides = array<i32>} : memref<1x4x32x256xf32, #tpu.memory_space<vmem>>, vector<1x1x32x256xf32>,
    %cst_76 = arith.constant dense<0.000000e+00> : vector<32x256xf32>
    %113 = tpu.matmul %87, %86, %cst_76 {dimension_numbers = #tpu.dot_dimension_numbers<[1], [0], [0], [1], [0, 0, 1, 1], [], []>} : vector<32x16xf32>, vector<16x256xf32>, vector<32x256xf32> -> vector<32x256xf32>
    %114 = vector.broadcast %88 : vector<32x1xf32> to vector<32x256xf32>
    %115 = arith.addf %113, %114 : vector<32x256xf32>
    %cst_77 = arith.constant 0.000000e+00 : f32
    %116 = vector.broadcast %cst_77 : f32 to vector<32x256xf32>
    %117 = arith.maximumf %115, %116 : vector<32x256xf32>
    %c0_78 = arith.constant 0 : index
    %c3_79 = arith.constant 3 : index
    %c0_80 = arith.constant 0 : index
    %c0_81 = arith.constant 0 : index
    %118 = vector.load %arg8[%c0_78, %c3_79, %c0_80, %c0_81] : memref<1x4x32x256xf32, #tpu.memory_space<vmem>>, vector<1x1x32x256xf32>
    %119 = vector.shape_cast %118 : vector<1x1x32x256xf32> to vector<32x256xf32>
    %120 = vector.shape_cast %117 : vector<32x256xf32> to vector<1x1x32x256xf32>
    tpu.vector_store %arg8[%c0_78, %c3_79, %c0_80, %c0_81], %120 {strides = array<i32>} : memref<1x4x32x256xf32, #tpu.memory_space<vmem>>, vector<1x1x32x256xf32>,
    return
  }
  func.func @transform_0(%arg0: i32) -> (i32, i32, i32) {
    %c0_i32 = arith.constant 0 : i32
    %c0_i32_0 = arith.constant 0 : i32
    %c0_i32_1 = arith.constant 0 : i32
    return %arg0, %c0_i32, %c0_i32_0 : i32, i32, i32
  }
  func.func @transform_1(%arg0: i32) -> (i32, i32) {
    %c0_i32 = arith.constant 0 : i32
    %c0_i32_0 = arith.constant 0 : i32
    %c0_i32_1 = arith.constant 0 : i32
    return %c0_i32, %c0_i32_0 : i32, i32
  }
  func.func @transform_2(%arg0: i32) -> (i32, i32, i32) {
    %c0_i32 = arith.constant 0 : i32
    %c0_i32_0 = arith.constant 0 : i32
    %c0_i32_1 = arith.constant 0 : i32
    %c0_i32_2 = arith.constant 0 : i32
    return %c0_i32, %c0_i32_0, %c0_i32_1 : i32, i32, i32
  }
  func.func @transform_3(%arg0: i32) -> (i32, i32) {
    %c0_i32 = arith.constant 0 : i32
    %c0_i32_0 = arith.constant 0 : i32
    %c0_i32_1 = arith.constant 0 : i32
    return %c0_i32, %c0_i32_0 : i32, i32
  }
  func.func @transform_4(%arg0: i32) -> (i32, i32) {
    %c0_i32 = arith.constant 0 : i32
    %c0_i32_0 = arith.constant 0 : i32
    %c0_i32_1 = arith.constant 0 : i32
    return %c0_i32, %c0_i32_0 : i32, i32
  }
  func.func @transform_5(%arg0: i32) -> (i32, i32) {
    %c0_i32 = arith.constant 0 : i32
    %c0_i32_0 = arith.constant 0 : i32
    %c0_i32_1 = arith.constant 0 : i32
    return %c0_i32, %c0_i32_0 : i32, i32
  }
  func.func @transform_6(%arg0: i32) -> (i32, i32) {
    %c0_i32 = arith.constant 0 : i32
    %c0_i32_0 = arith.constant 0 : i32
    %c0_i32_1 = arith.constant 0 : i32
    return %c0_i32, %c0_i32_0 : i32, i32
  }
  func.func @transform_7(%arg0: i32) -> (i32, i32, i32, i32) {
    %c0_i32 = arith.constant 0 : i32
    %c0_i32_0 = arith.constant 0 : i32
    %c0_i32_1 = arith.constant 0 : i32
    %c0_i32_2 = arith.constant 0 : i32
    return %arg0, %c0_i32, %c0_i32_0, %c0_i32_1 : i32, i32, i32, i32
  }
}

</mosaic_0001>

<bundles_post_ra>
// kernel: decoder_block_forward.1
= control target key start
LH: loop header
LB: loop body
LE: loop exit
PB: predicated region body
PF: predicated region fallthrough
CT: control target
= control target key end

     0   :  { %s1656_s24 = smov 0   ;;  %s2079_s0 = inlined_call_operand.vmem [shape: f32[2,64,256], index: 0, kind: input, shape index: {}]   ;;  %s2080_s1 = inlined_call_operand.vmem [shape: f32[16,64], index: 1, kind: input, shape index: {}]   ;;  %s2081_s2 = inlined_call_operand.vmem [shape: f32[9,16,16], index: 2, kind: input, shape index: {}]   ;;  %s2082_s3 = inlined_call_operand.vmem [shape: f32[32,16], index: 3, kind: input, shape index: {}]   ;;  %s2083_s4 = inlined_call_operand.vmem [shape: f32[16,1], index: 4, kind: input, shape index: {}]   ;;  %s2084_s5 = inlined_call_operand.vmem [shape: f32[16,1], index: 5, kind: input, shape index: {}]   ;;  %s2085_s6 = inlined_call_operand.vmem [shape: f32[32,1], index: 6, kind: input, shape index: {}]   ;;  %s2086_s7 = inlined_call_operand.vmem [shape: f32[2,4,32,256], index: 7, kind: output, shape index: {}]  }
   0x1 LB: > { %s1421_s25 = sadd.s32 4294967295, %s1609_s24   ;;  %p1425_p0 = scmp.ge.s32.totalorder %s1609_s24, 1  ;;  %s1609_s24 = sphi %s1656_s24, %s17_s24  }
   0x2   : > { %p237_p1 = scmp.lt.s32.totalorder %s1609_s24, 3 }
   0x4   : > { %p238_p2 = pnand %p1425_p0, %p237_p1 }
   0x5   : > { %p269_p3 = scmp.lt.s32.totalorder (!%p238_p2), %s1421_s25, 1  ;;  %s1613_s15 = smov (!%p238_p2), 112  }
   0x6   : > { %241 = sbr.rel (%p238_p2) target bundleno = 663 (0x297), region = 48  ;;  %s1614_s16 = smov (!%p238_p2), 127  }
   0x7   : > { %s1615_s17 = smov (!%p238_p2), 111  }
   0xb   : > { %v298_v0 = vld [vmem:[%s2083_s4 + $0x8] sm:$0xff]  ;;  %v1611_v1 = vmov 0   ;;  %s2092_s25 = smov (!%p269_p3, %s1421_s25), 1  ;;  %v297_v6 = vld [vmem:[%s2083_s4] sm:$0xff]  ;;  %vm309_vm0 = vcmask 523264   ;;  %v1612_v30 = vmov 0.0   ;;  %v378_v44 = vlaneseq }
   0xc   : > { %1575 = vset.pattern.permute.xlu0 %v1611_v1  ;;  %1601 = vset.pattern.permute.xlu1 %v1611_v1  ;;  %s1556_s28 = sshll.u32 %s2092_s25, 7  ;;  %v279_v19 = vld [vmem:[%s2080_s1] sm:$0xff]  ;;  %v280_v20 = vld [vmem:[%s2080_s1 + $0x8] sm:$0xff]  ;;  %v1438_v41 = vld [vmem:[%s2081_s2 + $0x50] sm:$0xff]  ;;  %vm474_vm1 = vcmask 130048   ;;  %vm425_vm2 = vcmask 1039360  }
   0xd   : > { %306 = vperm.xlu0 %1575, %v298_v0   ;;  %1602 = vset.pattern.permute.xlu2 %v1611_v1  ;;  %s273_s8 = scalar_lea.vmem %s2079_s0, %s1556_s28  ;;  %v464_v39 = vld [vmem:[%s2084_s5 + $0x8] sm:$0xff]  ;;  %v1454_v42 = vld [vmem:[%s2081_s2 + $0x70] sm:$0xff]  ;;  %v1439_v43 = vld [vmem:[%s2081_s2 + $0x58] sm:$0xff]  ;;  %v379_v46 = vand.u32 127, %v378_v44  ;;  %vm649_vm4 = vcmask 916480   ;;  %vm450_vm6 = vcmask 908288  }
   0xe   : > { %v295_v2 = vld [vmem:[%s273_s8 + $0x70] sm:$0xff]  ;;  %v296_v3 = vld [vmem:[%s273_s8 + $0x78] sm:$0xff]  ;;  %v293_v4 = vld [vmem:[%s273_s8 + $0x60] sm:$0xff]  ;;  %s1557_s11 = sshll.u32 %s2092_s25, 8 }
   0xf   : > { %324 = vmatpush.msra.mxu0 %v295_v2  ;;  %347 = vmatpush.msra.mxu1 %v296_v3  ;;  %v294_v5 = vld [vmem:[%s273_s8 + $0x68] sm:$0xff]  ;;  %v291_v7 = vld [vmem:[%s273_s8 + $0x50] sm:$0xff]  ;;  %v292_v8 = vld [vmem:[%s273_s8 + $0x58] sm:$0xff]  ;;  %v385_v48 = vand.u32 15, %v379_v46  ;;  %v380_v57 = vadd.s32 128, %v379_v46  ;;  %s2005_s14 = scalar_lea.vmem %s2086_s7, %s1557_s11 }
  0x10   : > { %v289_v9 = vld [vmem:[%s273_s8 + $0x40] sm:$0xff]  ;;  %v290_v10 = vld [vmem:[%s273_s8 + $0x48] sm:$0xff]  ;;  %v287_v11 = vld [vmem:[%s273_s8 + $0x30] sm:$0xff] }
  0x11   : > { %325 = vmatpush.msra.mxu0 %v293_v4  ;;  %348 = vmatpush.msra.mxu1 %v294_v5  ;;  %v288_v12 = vld [vmem:[%s273_s8 + $0x38] sm:$0xff]  ;;  %v285_v13 = vld [vmem:[%s273_s8 + $0x20] sm:$0xff]  ;;  %v286_v14 = vld [vmem:[%s273_s8 + $0x28] sm:$0xff]  ;;  %vm1731_vm3 = vcmp.lt.s32.totalorder %v385_v48, 15  ;;  %v392_v5 = vand.u32 15, %v380_v57 }
  0x12   : > { %v283_v15 = vld [vmem:[%s273_s8 + $0x10] sm:$0xff]  ;;  %v284_v16 = vld [vmem:[%s273_s8 + $0x18] sm:$0xff]  ;;  %v281_v17 = vld [vmem:[%s273_s8] sm:$0xff] }
  0x13   : > { %326 = vmatpush.msra.mxu0 %v291_v7  ;;  %349 = vmatpush.msra.mxu1 %v292_v8  ;;  %v282_v18 = vld [vmem:[%s273_s8 + $0x8] sm:$0xff]  ;;  %v463_v52 = vld [vmem:[%s2084_s5] sm:$0xff]  ;;  %v1436_v7 = vld [vmem:[%s2081_s2 + $0x30] sm:$0xff]  ;;  %vm1755_vm5 = vcmp.lt.s32.totalorder %v392_v5, 15 }
  0x14   : > { %v1032_v40 = vld [vmem:[%s2085_s6 + $0x8] sm:$0xff]  ;;  %v1464_v0 = vld [vmem:[%s2081_s2 + $0x20] sm:$0xff] }
  0x15   : > { %301 = vperm.xlu0 %1575, %v297_v6   ;;  %327 = vmatpush.msra.mxu0 %v289_v9 }
  0x16   : > { %350 = vmatpush.msra.mxu1 %v290_v10 }
  0x17   : > { %328 = vmatpush.msra.mxu0 %v287_v11 }
  0x18   : > { %351 = vmatpush.msra.mxu1 %v288_v12 }
  0x19   : > { %329 = vmatpush.msra.mxu0 %v285_v13 }
  0x1a   : > { %352 = vmatpush.msra.mxu1 %v286_v14  ;;  %v1465_v14 = vld [vmem:[%s2081_s2 + $0x28] sm:$0xff] }
  0x1b   : > { %330 = vmatpush.msra.mxu0 %v283_v15 }
  0x1c   : > { %353 = vmatpush.msra.mxu1 %v284_v16  ;;  %v1437_v16 = vld [vmem:[%s2081_s2 + $0x38] sm:$0xff] }
  0x1d   : > { %331 = vmatpush.msra.mxu0 %v281_v17 }
  0x1e   : > { %354 = vmatpush.msra.mxu1 %v282_v18  ;;  %1430 = vmatmul.msk.f32.vlgmr.msra.gmra.mxu0 %vm309_vm0, %v279_v19  ;;  %v1478_v18 = vld [vmem:[%s2081_s2 + $0x60] sm:$0xff] }
  0x1f   : > { %1432 = vmatmul.msk.f32.vlgmr.msra.gmra.mxu1 %vm309_vm0, %v279_v19  ;;  %v1455_v19 = vld [vmem:[%s2081_s2 + $0x78] sm:$0xff] }
  0x26   : > { %1431 = vmatmul.msk.f32.gmra.mxu0 %vm309_vm0, %v280_v20 }
  0x27   : > { %1433 = vmatmul.msk.f32.gmra.mxu1 %vm309_vm0, %v280_v20 }
  0x7f   : > { %v307_v21 = vpop.permute.xlu0 %306 }
  0x87   : > { %v302_v22 = vpop.permute.xlu0 %301 }
  0x9b   : > { %v333_v23 = vpop.f32.mrf.mxu0 }
  0x9c   : > { %v356_v24 = vpop.f32.mrf.mxu1  ;;  %v334_v25 = vadd.f32 %v333_v23, %v302_v22 }
  0x9d   : > { %v357_v26 = vadd.f32 %v356_v24, %v302_v22 }
  0x9e   : > { %v1682_v27 = vmax.f32 %v334_v25, 0.0 }
  0x9f   : > { %v1684_v28 = vmax.f32 %v357_v26, 0.0  ;;  %v1479_v26 = vld [vmem:[%s2081_s2 + $0x68] sm:$0xff] }
  0xa0   : > { %v1576_v31 = vpack.i.bf16 %v1682_v27, %v1612_v30 }
  0xa1   : > { %v1581_v29 = vpack.i.bf16 0.0, %v1684_v28 }
  0xa2   : > { %1577 = vrot.lane.b32.xlu1 %v1576_v31, %s1613_s15 }
  0xa3   : > { %1582 = vrot.lane.b32.xlu2 %v1581_v29, %s1613_s15  ;;  %v336_v32 = vpop.f32.mrf.mxu0 }
  0xa4   : > { %v359_v33 = vpop.f32.mrf.mxu1  ;;  %v337_v34 = vadd.f32 %v336_v32, %v307_v21  ;;  %v1033_v32 = vld [vmem:[%s2085_s6 + $0x10] sm:$0xff] }
  0xa5   : > { %v360_v35 = vadd.f32 %v359_v33, %v307_v21 }
  0xa6   : > { %v1688_v36 = vmax.f32 %v337_v34, 0.0  ;;  %v1434_v34 = vld [vmem:[%s2081_s2 + $0x40] sm:$0xff] }
  0xa7   : > { %v1690_v37 = vmax.f32 %v360_v35, 0.0  ;;  %v1453_v35 = vld [vmem:[%s2081_s2 + $0x18] sm:$0xff] }
  0xa8   : > { %495 = vmatpush.msra.mxu2 %v1688_v36  ;;  %605 = vmatpush.msrb.mxu0 %v1688_v36 }
  0xa9   : > { %421 = vrot.lane.b32.xlu0 %v1690_v37, %s1614_s16  ;;  %v1586_v38 = vpack.i.bf16 %v1690_v37, %v1688_v36  ;;  %518 = vmatpush.msra.mxu3 %v1690_v37 }
  0xaa   : > { %628 = vmatpush.msrb.mxu1 %v1690_v37  ;;  %496 = vmatpush.msra.mxu2 %v1682_v27 }
  0xab   : > { %419 = vrot.lane.b32.xlu2 %v1688_v36, %s1614_s16  ;;  %519 = vmatpush.msra.mxu3 %v1684_v28 }
  0xac   : > { %1587 = vrot.lane.b32.xlu1 %v1586_v38, %s1613_s15  ;;  %629 = vmatpush.msrb.mxu1 %v1684_v28  ;;  %v1489_v38 = vld [vmem:[%s2081_s2 + $0x88] sm:$0xff] }
  0xad   : > { %606 = vmatpush.msrb.mxu0 %v1682_v27  ;;  %1440 = vmatmul.msk.f32.vlgmr.msra.gmra.mxu2 %vm474_vm1, %v1438_v41 }
  0xae   : > { %1442 = vmatmul.msk.f32.vlgmr.msra.gmra.mxu3 %vm474_vm1, %v1438_v41  ;;  %1456 = vmatmul.msk.f32.vlgmr.msrb.gmra.mxu0 %vm474_vm1, %v1454_v42 }
  0xaf   : > { %1458 = vmatmul.msk.f32.vlgmr.msrb.gmra.mxu1 %vm474_vm1, %v1454_v42 }
  0xb1   : > { %415 = vrot.lane.b32.xlu0 %v1684_v28, %s1614_s16 }
  0xb3   : > { %413 = vrot.lane.b32.xlu2 %v1682_v27, %s1614_s16 }
  0xb4   : > { %1592 = vrot.lane.b32.xlu1 %v1612_v30, %s1614_s16 }
  0xb5   : > { %1441 = vmatmul.msk.f32.gmra.mxu2 %vm474_vm1, %v1439_v43 }
  0xb6   : > { %1443 = vmatmul.msk.f32.gmra.mxu3 %vm474_vm1, %v1439_v43 }
  0xb9   : > { %1597 = vrot.lane.b32.xlu0 %v1612_v30, %s1615_s17  ;;  %v1452_v30 = vld [vmem:[%s2081_s2 + $0x10] sm:$0xff] }
  0xbb   : > { %446 = vrot.lane.b32.xlu2 %v1690_v37, %s1615_s17 }
  0xbc   : > { %444 = vrot.lane.b32.xlu1 %v1688_v36, %s1615_s17 }
  0xc1   : > { %944 = vperm.xlu0 %1575, %v464_v39  }
  0xc3   : > { %440 = vrot.lane.b32.xlu2 %v1684_v28, %s1615_s17 }
  0xc4   : > { %438 = vrot.lane.b32.xlu1 %v1682_v27, %s1615_s17 }
  0xc9   : > { %1042 = vperm.xlu0 %1575, %v1032_v40  }
  0xcc   : > { %939 = vperm.xlu1 %1601, %v463_v52  }
  0xd4   : > { %1047 = vperm.xlu1 %1601, %v1033_v32  }
  0xfd   : > { %v1583_v45 = vpop.permute.xlu2 %1582 }
  0xfe   : > { %v1585_v54 = vunpack.i.h.bf16 %v1583_v45  ;;  %v1584_v55 = vunpack.i.l.bf16 %v1583_v45 }
 0x100   : > { %v651_v4 = vsel %vm649_vm4, %v1584_v55, %v1585_v54 }
 0x105   : > { %v420_v49 = vpop.permute.xlu2 %419 }
 0x10d   : > { %v414_v1 = vpop.permute.xlu2 %413 }
 0x114   : > { %v1578_v47 = vpop.permute.xlu1 %1577 }
 0x115   : > { %v1580_v58 = vunpack.i.h.bf16 %v1578_v47  ;;  %v1579_v59 = vunpack.i.l.bf16 %v1578_v47  ;;  %v447_v15 = vpop.permute.xlu2 %446 }
 0x117   : > { %v650_v3 = vsel %vm649_vm4, %v1580_v58, %v1584_v55 }
 0x11b   : > { %v422_v51 = vpop.permute.xlu0 %421 }
 0x11c   : > { %v428_v53 = vsel %vm425_vm2, %v420_v49, %v422_v51 }
 0x11d   : > { %1444 = vmatpush.msk.msrb.mxu2 %vm1731_vm3, %v428_v53  ;;  %v441_v21 = vpop.permute.xlu2 %440 }
 0x11e   : > { %v1588_v56 = vpop.permute.xlu1 %1587 }
 0x11f   : > { %v1590_v60 = vunpack.i.h.bf16 %v1588_v56  ;;  %v1589_v61 = vunpack.i.l.bf16 %v1588_v56 }
 0x121   : > { %v652_v62 = vsel %vm649_vm4, %v1589_v61, %v1590_v60  ;;  %v653_v63 = vsel %vm649_vm4, %v1590_v60, %v1579_v59 }
 0x122   : > { %735 = vmatpush.msra.mxu0 %v652_v62  ;;  %758 = vmatpush.msra.mxu1 %v653_v63 }
 0x123   : > { %v416_v2 = vpop.permute.xlu0 %415 }
 0x124   : > { %736 = vmatpush.msra.mxu0 %v650_v3  ;;  %759 = vmatpush.msra.mxu1 %v651_v4  ;;  %v426_v6 = vsel %vm425_vm2, %v414_v1, %v416_v2  ;;  %v1885_v1 = vld [vmem:[%s2082_s3] sm:$0xff] }
 0x125   : > { %1466 = vmatmul.msk.f32.vlgmr.msra.gmra.mxu0 %vm474_vm1, %v1464_v0  ;;  %1468 = vmatmul.msk.f32.vlgmr.msra.gmra.mxu1 %vm474_vm1, %v1464_v0 }
 0x126   : > { %1480 = vmatpush.msk.msrb.mxu0 %vm1731_vm3, %v428_v53  ;;  %v1593_v8 = vpop.permute.xlu1 %1592  ;;  %1445 = vmatpush.msk.msrb.mxu2 %vm1731_vm3, %v426_v6 }
 0x127   : > { %v1595_v9 = vunpack.i.h.bf16 %v1593_v8  ;;  %v1594_v10 = vunpack.i.l.bf16 %v1593_v8  ;;  %1446 = vmatmul.msk.f32.vlgmr.msrb.gmra.mxu2 %vm474_vm1, %v1436_v7 }
 0x128   : > { %1558 = vmatpush.msra.mxu2 %v1688_v36  ;;  %1481 = vmatpush.msk.msrb.mxu0 %vm1731_vm3, %v426_v6 }
 0x129   : > { %v429_v12 = vsel %vm425_vm2, %v422_v51, %v1594_v10  ;;  %v427_v13 = vsel %vm425_vm2, %v416_v2, %v1595_v9  ;;  %v1898_v10 = vld [vmem:[%s2082_s3 + $0x8] sm:$0xff] }
 0x12a   : > { %967 = vmatpush.msra.mxu0 %v1688_v36  ;;  %1559 = vmatpush.msra.mxu2 %v1682_v27 }
 0x12b   : > { %1448 = vmatpush.msk.msrb.mxu3 %vm1755_vm5, %v429_v12  ;;  %1484 = vmatpush.msk.msrb.mxu1 %vm1755_vm5, %v429_v12  ;;  %v1598_v22 = vpop.permute.xlu0 %1597  ;;  %v608_v40 = vpop.f32.mrf.mxu0 }
 0x12c   : > { %678 = vmatpush.msrb.mxu2 %v652_v62  ;;  %968 = vmatpush.msra.mxu0 %v1682_v27  ;;  %v1599_v25 = vunpack.i.l.bf16 %v1598_v22  ;;  %v1600_v29 = vunpack.i.h.bf16 %v1598_v22  ;;  %v631_v41 = vpop.f32.mrf.mxu1 }
 0x12d   : > { %1449 = vmatpush.msk.msrb.mxu3 %vm1755_vm5, %v427_v13  ;;  %1485 = vmatpush.msk.msrb.mxu1 %vm1755_vm5, %v427_v13 }
 0x12e   : > { %679 = vmatpush.msrb.mxu2 %v650_v3  ;;  %1450 = vmatmul.msk.f32.vlgmr.msrb.gmra.mxu3 %vm474_vm1, %v1436_v7  ;;  %v445_v17 = vpop.permute.xlu1 %444  ;;  %v454_v31 = vsel %vm450_vm6, %v447_v15, %v1599_v25  ;;  %v452_v33 = vsel %vm450_vm6, %v441_v21, %v1600_v29 }
 0x12f   : > { %1467 = vmatmul.msk.f32.gmra.mxu0 %vm474_vm1, %v1465_v14  ;;  %1560 = vmatpush.msra.mxu3 %v1690_v37  ;;  %v453_v23 = vsel %vm450_vm6, %v445_v17, %v447_v15  ;;  %v1907_v15 = vld [vmem:[%s2082_s3 + $0x10] sm:$0xff] }
 0x130   : > { %1469 = vmatmul.msk.f32.gmra.mxu1 %vm474_vm1, %v1465_v14  ;;  %1447 = vmatmul.msk.f32.gmra.mxu2 %vm474_vm1, %v1437_v16  ;;  %v498_v39 = vpop.f32.mrf.mxu2 }
 0x131   : > { %990 = vmatpush.msra.mxu1 %v1690_v37  ;;  %1561 = vmatpush.msra.mxu3 %v1684_v28  ;;  %v521_v42 = vpop.f32.mrf.mxu3 }
 0x133   : > { %991 = vmatpush.msra.mxu1 %v1684_v28  ;;  %701 = vmatpush.msrb.mxu3 %v653_v63  ;;  %v1878_v57 = vpop.permute.xlu0 %944 }
 0x135   : > { %702 = vmatpush.msrb.mxu3 %v651_v4 }
 0x136   : > { %1451 = vmatmul.msk.f32.gmra.mxu3 %vm474_vm1, %v1437_v16  ;;  %v439_v20 = vpop.permute.xlu1 %438 }
 0x137   : > { %1482 = vmatmul.msk.f32.vlgmr.msrb.gmra.mxu0 %vm474_vm1, %v1478_v18  ;;  %v451_v24 = vsel %vm450_vm6, %v439_v20, %v441_v21 }
 0x138   : > { %1486 = vmatmul.msk.f32.vlgmr.msrb.gmra.mxu1 %vm474_vm1, %v1478_v18  ;;  %1457 = vmatmul.msk.f32.vlgmr.msra.gmra.mxu2 %vm474_vm1, %v1455_v19  ;;  %v501_v43 = vpop.f32.mrf.mxu2 }
 0x139   : > { %1470 = vmatpush.msk.msra.mxu2 %vm1731_vm3, %v453_v23  ;;  %v524_v46 = vpop.f32.mrf.mxu3 }
 0x13b   : > { %1471 = vmatpush.msk.msra.mxu2 %vm1731_vm3, %v451_v24 }
 0x13e   : > { %1459 = vmatmul.msk.f32.vlgmr.msra.gmra.mxu3 %vm474_vm1, %v1455_v19  ;;  %v1872_v52 = vpop.permute.xlu1 %939 }
 0x13f   : > { %1483 = vmatmul.msk.f32.gmra.mxu0 %vm474_vm1, %v1479_v26  ;;  %1474 = vmatpush.msk.msra.mxu3 %vm1755_vm5, %v454_v31 }
 0x140   : > { %1487 = vmatmul.msk.f32.gmra.mxu1 %vm474_vm1, %v1479_v26  ;;  %1460 = vmatmul.msk.f32.vlgmr.msrb.gmra.mxu2 %vm474_vm1, %v1452_v30 }
 0x141   : > { %1475 = vmatpush.msk.msra.mxu3 %vm1755_vm5, %v452_v33  ;;  %901 = vmatpush.msrb.mxu2 %v1688_v36  ;;  %v710_v36 = vld [vmem:[%s2081_s2] sm:$0xff] }
 0x143   : > { %902 = vmatpush.msrb.mxu2 %v1682_v27  ;;  %v1435_v27 = vld [vmem:[%s2081_s2 + $0x48] sm:$0xff] }
 0x146   : > { %1462 = vmatmul.msk.f32.vlgmr.msrb.gmra.mxu3 %vm474_vm1, %v1452_v30 }
 0x147   : > { %1494 = vmatmul.msk.f32.vlgmr.msra.gmra.mxu0 %vm474_vm1, %v1434_v34  ;;  %924 = vmatpush.msrb.mxu3 %v1690_v37  ;;  %v1488_v37 = vld [vmem:[%s2081_s2 + $0x80] sm:$0xff] }
 0x148   : > { %1496 = vmatmul.msk.f32.vlgmr.msra.gmra.mxu1 %vm474_vm1, %v1434_v34  ;;  %1461 = vmatmul.msk.f32.gmra.mxu2 %vm474_vm1, %v1453_v35 }
 0x149   : > { %925 = vmatpush.msrb.mxu3 %v1684_v28  ;;  %v711_v28 = vld [vmem:[%s2081_s2 + $0x8] sm:$0xff] }
 0x14e   : > { %1463 = vmatmul.msk.f32.gmra.mxu3 %vm474_vm1, %v1453_v35 }
 0x14f   : > { %1495 = vmatmul.msk.f32.gmra.mxu0 %vm474_vm1, %v1435_v27 }
 0x150   : > { %1497 = vmatmul.msk.f32.gmra.mxu1 %vm474_vm1, %v1435_v27  ;;  %1472 = vmatmul.msk.f32.vlgmr.msra.gmra.mxu2 %vm474_vm1, %v710_v36 }
 0x156   : > { %1476 = vmatmul.msk.f32.vlgmr.msra.gmra.mxu3 %vm474_vm1, %v710_v36 }
 0x158   : > { %1473 = vmatmul.msk.f32.gmra.mxu2 %vm474_vm1, %v711_v28 }
 0x15e   : > { %1477 = vmatmul.msk.f32.gmra.mxu3 %vm474_vm1, %v711_v28 }
 0x160   : > { %1490 = vmatmul.msk.f32.vlgmr.msrb.gmra.mxu2 %vm474_vm1, %v1488_v37 }
 0x166   : > { %1492 = vmatmul.msk.f32.vlgmr.msrb.gmra.mxu3 %vm474_vm1, %v1488_v37 }
 0x168   : > { %1491 = vmatmul.msk.f32.gmra.mxu2 %vm474_vm1, %v1489_v38 }
 0x16e   : > { %1493 = vmatmul.msk.f32.gmra.mxu3 %vm474_vm1, %v1489_v38  ;;  %v1930_v38 = vld [vmem:[%s2082_s3 + $0x18] sm:$0xff] }
 0x1a2   : > { %v1864_v44 = vpop.f32.mrf.mxu0  ;;  %v1866_v45 = vpop.f32.mrf.mxu1 }
 0x1aa   : > { %v550_v47 = vpop.f32.mrf.mxu2 }
 0x1ab   : > { %v551_v51 = vadd.f32 %v550_v47, %v498_v39 }
 0x1ac   : > { %v1868_v48 = vpop.f32.mrf.mxu0 }
 0x1ad   : > { %v1870_v49 = vpop.f32.mrf.mxu1  ;;  %v1003_v59 = vadd.f32 %v1872_v52, %v551_v51 }
 0x1af   : > { %v1007_v0 = vmax.f32 %v1003_v59, 0.0 }
 0x1b1   : > { %v573_v50 = vpop.f32.mrf.mxu3 }
 0x1b2   : > { %v574_v60 = vadd.f32 %v573_v50, %v521_v42 }
 0x1b3   : > { %v553_v53 = vpop.f32.mrf.mxu2 }
 0x1b4   : > { %v1874_v54 = vpop.f32.mrf.mxu0  ;;  %v554_v55 = vadd.f32 %v553_v53, %v501_v43  ;;  %v1004_v4 = vadd.f32 %v1872_v52, %v574_v60 }
 0x1b5   : > { %v1876_v56 = vpop.f32.mrf.mxu1 }
 0x1b6   : > { %v1005_v58 = vadd.f32 %v1878_v57, %v554_v55  ;;  %v1008_v8 = vmax.f32 %v1004_v4, 0.0 }
 0x1b8   : > { %v1009_v61 = vmax.f32 %v1005_v58, 0.0 }
 0x1b9   : > { %v576_v62 = vpop.f32.mrf.mxu3 }
 0x1ba   : > { %v577_v63 = vadd.f32 %v576_v62, %v524_v46  ;;  %1155 = vmatpush.msrb.mxu0 %v1009_v61  ;;  %v1031_v46 = vld [vmem:[%s2085_s6] sm:$0xff] }
 0x1bb   : > { %v611_v2 = vpop.f32.mrf.mxu2  ;;  %1037 = vperm.xlu2 %1602, %v1031_v46  }
 0x1bc   : > { %v1887_v3 = vpop.f32.mrf.mxu0  ;;  %v1006_v5 = vadd.f32 %v1878_v57, %v577_v63  ;;  %1156 = vmatpush.msrb.mxu0 %v1007_v0 }
 0x1bd   : > { %v1891_v6 = vpop.f32.mrf.mxu1  ;;  %1506 = vmatmul.msk.f32.vlgmr.msrb.gmra.mxu0 %vm474_vm1, %v1885_v1 }
 0x1be   : > { %v1010_v7 = vmax.f32 %v1006_v5, 0.0 }
 0x1c0   : > { %1184 = vmatpush.msrb.mxu1 %v1010_v7 }
 0x1c1   : > { %v634_v9 = vpop.f32.mrf.mxu3 }
 0x1c2   : > { %1185 = vmatpush.msrb.mxu1 %v1008_v8 }
 0x1c3   : > { %v681_v11 = vpop.f32.mrf.mxu2  ;;  %1510 = vmatmul.msk.f32.vlgmr.msrb.gmra.mxu1 %vm474_vm1, %v1885_v1 }
 0x1c4   : > { %v970_v12 = vpop.f32.mrf.mxu0  ;;  %v682_v22 = vadd.f32 %v681_v11, %v608_v40 }
 0x1c5   : > { %v993_v13 = vpop.f32.mrf.mxu1  ;;  %1507 = vmatmul.msk.f32.gmra.mxu0 %vm474_vm1, %v1898_v10  ;;  %v971_v18 = vadd.f32 %v970_v12, %v1872_v52 }
 0x1c6   : > { %v994_v23 = vadd.f32 %v993_v13, %v1872_v52  ;;  %v1011_v32 = vadd.f32 %v1872_v52, %v682_v22  ;;  %v2009_v13 = vpop.permute.xlu0 %1042 }
 0x1c7   : > { %v999_v30 = vmax.f32 %v971_v18, 0.0 }
 0x1c8   : > { %v1000_v33 = vmax.f32 %v994_v23, 0.0  ;;  %v1015_v39 = vmax.f32 %v1011_v32, 0.0 }
 0x1c9   : > { %v704_v14 = vpop.f32.mrf.mxu3 }
 0x1ca   : > { %v705_v31 = vadd.f32 %v704_v14, %v631_v41 }
 0x1cb   : > { %v684_v16 = vpop.f32.mrf.mxu2  ;;  %1511 = vmatmul.msk.f32.gmra.mxu1 %vm474_vm1, %v1898_v10 }
 0x1cc   : > { %v973_v17 = vpop.f32.mrf.mxu0  ;;  %v685_v19 = vadd.f32 %v684_v16, %v611_v2  ;;  %v1012_v28 = vadd.f32 %v1872_v52, %v705_v31 }
 0x1cd   : > { %v974_v20 = vadd.f32 %v973_v17, %v1878_v57  ;;  %v996_v21 = vpop.f32.mrf.mxu1  ;;  %1508 = vmatmul.msk.f32.gmra.mxu0 %vm474_vm1, %v1907_v15 }
 0x1ce   : > { %v997_v24 = vadd.f32 %v996_v21, %v1878_v57  ;;  %v1013_v25 = vadd.f32 %v1878_v57, %v685_v19  ;;  %v1016_v41 = vmax.f32 %v1012_v28, 0.0 }
 0x1cf   : > { %v1001_v26 = vmax.f32 %v974_v20, 0.0  ;;  %v2015_v20 = vpop.permute.xlu1 %1047 }
 0x1d0   : > { %v1002_v29 = vmax.f32 %v997_v24, 0.0  ;;  %v1017_v34 = vmax.f32 %v1013_v25, 0.0 }
 0x1d1   : > { %1081 = vmatpush.msra.mxu2 %v1001_v26  ;;  %v707_v35 = vpop.f32.mrf.mxu3 }
 0x1d2   : > { %1110 = vmatpush.msra.mxu3 %v1002_v29  ;;  %v708_v27 = vadd.f32 %v707_v35, %v634_v9 }
 0x1d3   : > { %1082 = vmatpush.msra.mxu2 %v999_v30  ;;  %v790_v36 = vpop.f32.mrf.mxu2  ;;  %1512 = vmatmul.msk.f32.gmra.mxu1 %vm474_vm1, %v1907_v15 }
 0x1d4   : > { %1111 = vmatpush.msra.mxu3 %v1000_v33  ;;  %1498 = vmatmul.msk.f32.vlgmr.msra.gmra.mxu2 %vm474_vm1, %v1885_v1  ;;  %v1014_v37 = vadd.f32 %v1878_v57, %v708_v27  ;;  %v791_v51 = vadd.f32 %v790_v36, %v1864_v44 }
 0x1d5   : > { %1502 = vmatmul.msk.f32.vlgmr.msra.gmra.mxu3 %vm474_vm1, %v1885_v1  ;;  %1230 = vmatpush.msrb.mxu2 %v1017_v34 }
 0x1d6   : > { %1509 = vmatmul.msk.f32.gmra.mxu0 %vm474_vm1, %v1930_v38  ;;  %v1018_v40 = vmax.f32 %v1014_v37, 0.0  ;;  %v874_v55 = vadd.f32 %v1874_v54, %v791_v51 }
 0x1d7   : > { %1231 = vmatpush.msrb.mxu2 %v1015_v39 }
 0x1d8   : > { %1259 = vmatpush.msrb.mxu3 %v1018_v40 }
 0x1d9   : > { %v813_v42 = vpop.f32.mrf.mxu3 }
 0x1da   : > { %1260 = vmatpush.msrb.mxu3 %v1016_v41  ;;  %v814_v59 = vadd.f32 %v813_v42, %v1866_v45 }
 0x1db   : > { %v793_v43 = vpop.f32.mrf.mxu2  ;;  %1513 = vmatmul.msk.f32.gmra.mxu1 %vm474_vm1, %v1930_v38 }
 0x1dc   : > { %1499 = vmatmul.msk.f32.gmra.mxu2 %vm474_vm1, %v1898_v10  ;;  %v794_v53 = vadd.f32 %v793_v43, %v1868_v48  ;;  %v875_v54 = vadd.f32 %v1876_v56, %v814_v59 }
 0x1dd   : > { %1503 = vmatmul.msk.f32.gmra.mxu3 %vm474_vm1, %v1898_v10 }
 0x1de   : > { %v876_v61 = vadd.f32 %v1887_v3, %v794_v53 }
 0x1e1   : > { %v816_v47 = vpop.f32.mrf.mxu3 }
 0x1e2   : > { %v817_v63 = vadd.f32 %v816_v47, %v1870_v49  ;;  %v1034_v49 = vld [vmem:[%s2085_s6 + $0x18] sm:$0xff] }
 0x1e3   : > { %v904_v50 = vpop.f32.mrf.mxu2  ;;  %1052 = vperm.xlu2 %1602, %v1034_v49  }
 0x1e4   : > { %1500 = vmatmul.msk.f32.gmra.mxu2 %vm474_vm1, %v1907_v15  ;;  %v933_v60 = vadd.f32 %v904_v50, %v874_v55  ;;  %v877_v3 = vadd.f32 %v1891_v6, %v817_v63 }
 0x1e5   : > { %1504 = vmatmul.msk.f32.gmra.mxu3 %vm474_vm1, %v1907_v15 }
 0x1e6   : > { %v1019_v48 = vadd.f32 %v1872_v52, %v933_v60 }
 0x1e8   : > { %v1023_v5 = vmax.f32 %v1019_v48, 0.0 }
 0x1e9   : > { %v927_v58 = vpop.f32.mrf.mxu3 }
 0x1ea   : > { %v934_v45 = vadd.f32 %v927_v58, %v875_v54 }
 0x1eb   : > { %v907_v62 = vpop.f32.mrf.mxu2 }
 0x1ec   : > { %1501 = vmatmul.msk.f32.gmra.mxu2 %vm474_vm1, %v1930_v38  ;;  %v935_v44 = vadd.f32 %v907_v62, %v876_v61  ;;  %v1020_v8 = vadd.f32 %v1872_v52, %v934_v45 }
 0x1ed   : > { %1505 = vmatmul.msk.f32.gmra.mxu3 %vm474_vm1, %v1930_v38 }
 0x1ee   : > { %v1021_v0 = vadd.f32 %v1878_v57, %v935_v44  ;;  %v1024_v9 = vmax.f32 %v1020_v8, 0.0 }
 0x1f0   : > { %v1025_v2 = vmax.f32 %v1021_v0, 0.0 }
 0x1f1   : > { %v930_v4 = vpop.f32.mrf.mxu3 }
 0x1f2   : > { %v936_v7 = vadd.f32 %v930_v4, %v877_v3  ;;  %1305 = vmatpush.msra.mxu0 %v1025_v2 }
 0x1f4   : > { %1522 = vmatmul.msk.f32.vlgmr.msrb.gmra.mxu2 %vm474_vm1, %v1885_v1  ;;  %v1022_v56 = vadd.f32 %v1878_v57, %v936_v7  ;;  %1306 = vmatpush.msra.mxu0 %v1023_v5 }
 0x1f5   : > { %1526 = vmatmul.msk.f32.vlgmr.msrb.gmra.mxu3 %vm474_vm1, %v1885_v1  ;;  %1538 = vmatmul.msk.f32.vlgmr.msra.gmra.mxu0 %vm474_vm1, %v1885_v1 }
 0x1f6   : > { %v1026_v6 = vmax.f32 %v1022_v56, 0.0 }
 0x1f8   : > { %1334 = vmatpush.msra.mxu1 %v1026_v6 }
 0x1fa   : > { %1335 = vmatpush.msra.mxu1 %v1024_v9 }
 0x1fb   : > { %1542 = vmatmul.msk.f32.vlgmr.msra.gmra.mxu1 %vm474_vm1, %v1885_v1 }
 0x1fc   : > { %1523 = vmatmul.msk.f32.gmra.mxu2 %vm474_vm1, %v1898_v10 }
 0x1fd   : > { %1527 = vmatmul.msk.f32.gmra.mxu3 %vm474_vm1, %v1898_v10  ;;  %1539 = vmatmul.msk.f32.gmra.mxu0 %vm474_vm1, %v1898_v10 }
 0x203   : > { %1543 = vmatmul.msk.f32.gmra.mxu1 %vm474_vm1, %v1898_v10 }
 0x204   : > { %1524 = vmatmul.msk.f32.gmra.mxu2 %vm474_vm1, %v1907_v15 }
 0x205   : > { %1528 = vmatmul.msk.f32.gmra.mxu3 %vm474_vm1, %v1907_v15  ;;  %1540 = vmatmul.msk.f32.gmra.mxu0 %vm474_vm1, %v1907_v15 }
 0x20b   : > { %1544 = vmatmul.msk.f32.gmra.mxu1 %vm474_vm1, %v1907_v15 }
 0x20c   : > { %1525 = vmatmul.msk.f32.gmra.mxu2 %vm474_vm1, %v1930_v38 }
 0x20d   : > { %1529 = vmatmul.msk.f32.gmra.mxu3 %vm474_vm1, %v1930_v38  ;;  %1541 = vmatmul.msk.f32.gmra.mxu0 %vm474_vm1, %v1930_v38 }
 0x213   : > { %1545 = vmatmul.msk.f32.gmra.mxu1 %vm474_vm1, %v1930_v38 }
 0x215   : > { %v1998_v57 = vpop.permute.xlu2 %1037 }
 0x23a   : > { %v1158_v52 = vpop.f32.mrf.mxu0 }
 0x23b   : > { %v1159_v1 = vadd.f32 %v1158_v52, %v1998_v57 }
 0x23d   : > { %v1199_v10 = vmax.f32 %v1159_v1, 0.0  ;;  %v2021_v30 = vpop.permute.xlu2 %1052 }
 0x23f   : > { %1514 = vst [vmem:[%s2005_s14 + $0x40] sm:$0xff] %v1199_v10 }
 0x240   : > { %v1187_v11 = vpop.f32.mrf.mxu1 }
 0x241   : > { %v1188_v12 = vadd.f32 %v1187_v11, %v1998_v57 }
 0x242   : > { %v1161_v14 = vpop.f32.mrf.mxu0 }
 0x243   : > { %v1162_v15 = vadd.f32 %v1161_v14, %v2009_v13  ;;  %v1200_v16 = vmax.f32 %v1188_v12, 0.0 }
 0x245   : > { %v1201_v17 = vmax.f32 %v1162_v15, 0.0  ;;  %1515 = vst [vmem:[%s2005_s14 + $0x48] sm:$0xff] %v1200_v16 }
 0x247   : > { %1516 = vst [vmem:[%s2005_s14 + $0x50] sm:$0xff] %v1201_v17 }
 0x248   : > { %v1190_v18 = vpop.f32.mrf.mxu1 }
 0x249   : > { %v1191_v19 = vadd.f32 %v1190_v18, %v2009_v13 }
 0x24a   : > { %v1164_v21 = vpop.f32.mrf.mxu0 }
 0x24b   : > { %v1202_v22 = vmax.f32 %v1191_v19, 0.0  ;;  %v1165_v23 = vadd.f32 %v1164_v21, %v2015_v20 }
 0x24d   : > { %1517 = vst [vmem:[%s2005_s14 + $0x58] sm:$0xff] %v1202_v22  ;;  %v1203_v24 = vmax.f32 %v1165_v23, 0.0 }
 0x24f   : > { %1518 = vst [vmem:[%s2005_s14 + $0x60] sm:$0xff] %v1203_v24 }
 0x250   : > { %v1193_v25 = vpop.f32.mrf.mxu1 }
 0x251   : > { %v1194_v26 = vadd.f32 %v1193_v25, %v2015_v20 }
 0x253   : > { %v1167_v29 = vpop.f32.mrf.mxu0  ;;  %v1204_v32 = vmax.f32 %v1194_v26, 0.0 }
 0x254   : > { %v1168_v31 = vadd.f32 %v1167_v29, %v2021_v30 }
 0x255   : > { %1519 = vst [vmem:[%s2005_s14 + $0x68] sm:$0xff] %v1204_v32 }
 0x256   : > { %v1205_v33 = vmax.f32 %v1168_v31, 0.0 }
 0x257   : > { %v1084_v34 = vpop.f32.mrf.mxu2 }
 0x258   : > { %v1113_v35 = vpop.f32.mrf.mxu3  ;;  %v1085_v27 = vadd.f32 %v1084_v34, %v1998_v57  ;;  %1520 = vst [vmem:[%s2005_s14 + $0x70] sm:$0xff] %v1205_v33  ;;  %v1196_v28 = vpop.f32.mrf.mxu1 }
 0x259   : > { %v1114_v36 = vadd.f32 %v1113_v35, %v1998_v57  ;;  %v1197_v39 = vadd.f32 %v1196_v28, %v2021_v30 }
 0x25a   : > { %v1125_v37 = vmax.f32 %v1085_v27, 0.0 }
 0x25b   : > { %v1126_v38 = vmax.f32 %v1114_v36, 0.0  ;;  %v1206_v40 = vmax.f32 %v1197_v39, 0.0 }
 0x25c   : > { %1133 = vst [vmem:[%s2005_s14] sm:$0xff] %v1125_v37 }
 0x25d   : > { %1134 = vst [vmem:[%s2005_s14 + $0x8] sm:$0xff] %v1126_v38 }
 0x25e   : > { %1521 = vst [vmem:[%s2005_s14 + $0x78] sm:$0xff] %v1206_v40 }
 0x25f   : > { %v1087_v41 = vpop.f32.mrf.mxu2 }
 0x260   : > { %v1088_v42 = vadd.f32 %v1087_v41, %v2009_v13  ;;  %v1116_v43 = vpop.f32.mrf.mxu3 }
 0x261   : > { %v1117_v46 = vadd.f32 %v1116_v43, %v2009_v13 }
 0x262   : > { %v1127_v47 = vmax.f32 %v1088_v42, 0.0 }
 0x263   : > { %v1128_v50 = vmax.f32 %v1117_v46, 0.0 }
 0x264   : > { %1135 = vst [vmem:[%s2005_s14 + $0x10] sm:$0xff] %v1127_v47 }
 0x265   : > { %1136 = vst [vmem:[%s2005_s14 + $0x18] sm:$0xff] %v1128_v50 }
 0x267   : > { %v1090_v51 = vpop.f32.mrf.mxu2 }
 0x268   : > { %v1091_v53 = vadd.f32 %v1090_v51, %v2015_v20  ;;  %v1119_v55 = vpop.f32.mrf.mxu3 }
 0x269   : > { %v1120_v58 = vadd.f32 %v1119_v55, %v2015_v20 }
 0x26a   : > { %v1129_v59 = vmax.f32 %v1091_v53, 0.0 }
 0x26b   : > { %v1130_v60 = vmax.f32 %v1120_v58, 0.0 }
 0x26c   : > { %1137 = vst [vmem:[%s2005_s14 + $0x20] sm:$0xff] %v1129_v59 }
 0x26d   : > { %1138 = vst [vmem:[%s2005_s14 + $0x28] sm:$0xff] %v1130_v60 }
 0x26f   : > { %v1093_v61 = vpop.f32.mrf.mxu2 }
 0x270   : > { %v1122_v62 = vpop.f32.mrf.mxu3  ;;  %v1094_v63 = vadd.f32 %v1093_v61, %v2021_v30 }
 0x271   : > { %v1123_v44 = vadd.f32 %v1122_v62, %v2021_v30 }
 0x272   : > { %v1131_v48 = vmax.f32 %v1094_v63, 0.0  ;;  %v1308_v54 = vpop.f32.mrf.mxu0 }
 0x273   : > { %v1132_v0 = vmax.f32 %v1123_v44, 0.0  ;;  %v1309_v45 = vadd.f32 %v1308_v54, %v1998_v57 }
 0x274   : > { %1139 = vst [vmem:[%s2005_s14 + $0x30] sm:$0xff] %v1131_v48 }
 0x275   : > { %1140 = vst [vmem:[%s2005_s14 + $0x38] sm:$0xff] %v1132_v0  ;;  %v1349_v2 = vmax.f32 %v1309_v45, 0.0 }
 0x277   : > { %v1233_v3 = vpop.f32.mrf.mxu2  ;;  %1546 = vst [vmem:[%s2005_s14 + $0xc0] sm:$0xff] %v1349_v2 }
 0x278   : > { %v1234_v4 = vadd.f32 %v1233_v3, %v1998_v57  ;;  %v1262_v5 = vpop.f32.mrf.mxu3  ;;  %v1337_v49 = vpop.f32.mrf.mxu1 }
 0x279   : > { %v1263_v7 = vadd.f32 %v1262_v5, %v1998_v57  ;;  %v1338_v56 = vadd.f32 %v1337_v49, %v1998_v57 }
 0x27a   : > { %v1274_v8 = vmax.f32 %v1234_v4, 0.0  ;;  %v1311_v9 = vpop.f32.mrf.mxu0 }
 0x27b   : > { %v1275_v6 = vmax.f32 %v1263_v7, 0.0  ;;  %v1350_v52 = vmax.f32 %v1338_v56, 0.0  ;;  %v1312_v1 = vadd.f32 %v1311_v9, %v2009_v13 }
 0x27c   : > { %1530 = vst [vmem:[%s2005_s14 + $0x80] sm:$0xff] %v1274_v8 }
 0x27d   : > { %1531 = vst [vmem:[%s2005_s14 + $0x88] sm:$0xff] %v1275_v6  ;;  %v1351_v10 = vmax.f32 %v1312_v1, 0.0 }
 0x27e   : > { %1547 = vst [vmem:[%s2005_s14 + $0xc8] sm:$0xff] %v1350_v52 }
 0x27f   : > { %v1236_v11 = vpop.f32.mrf.mxu2  ;;  %1548 = vst [vmem:[%s2005_s14 + $0xd0] sm:$0xff] %v1351_v10 }
 0x280   : > { %v1237_v12 = vadd.f32 %v1236_v11, %v2009_v13  ;;  %v1265_v14 = vpop.f32.mrf.mxu3  ;;  %v1340_v15 = vpop.f32.mrf.mxu1 }
 0x281   : > { %v1266_v57 = vadd.f32 %v1265_v14, %v2009_v13  ;;  %v1341_v17 = vadd.f32 %v1340_v15, %v2009_v13 }
 0x282   : > { %v1276_v16 = vmax.f32 %v1237_v12, 0.0  ;;  %v1314_v19 = vpop.f32.mrf.mxu0 }
 0x283   : > { %v1277_v18 = vmax.f32 %v1266_v57, 0.0  ;;  %v1352_v21 = vmax.f32 %v1341_v17, 0.0  ;;  %v1315_v22 = vadd.f32 %v1314_v19, %v2015_v20 }
 0x284   : > { %1532 = vst [vmem:[%s2005_s14 + $0x90] sm:$0xff] %v1276_v16 }
 0x285   : > { %1533 = vst [vmem:[%s2005_s14 + $0x98] sm:$0xff] %v1277_v18  ;;  %v1353_v23 = vmax.f32 %v1315_v22, 0.0 }
 0x286   : > { %1549 = vst [vmem:[%s2005_s14 + $0xd8] sm:$0xff] %v1352_v21 }
 0x287   : > { %v1239_v24 = vpop.f32.mrf.mxu2  ;;  %1550 = vst [vmem:[%s2005_s14 + $0xe0] sm:$0xff] %v1353_v23 }
 0x288   : > { %v1240_v25 = vadd.f32 %v1239_v24, %v2015_v20  ;;  %v1268_v26 = vpop.f32.mrf.mxu3  ;;  %v1343_v29 = vpop.f32.mrf.mxu1 }
 0x289   : > { %v1269_v13 = vadd.f32 %v1268_v26, %v2015_v20  ;;  %v1344_v32 = vadd.f32 %v1343_v29, %v2015_v20 }
 0x28a   : > { %v1278_v31 = vmax.f32 %v1240_v25, 0.0  ;;  %v1317_v34 = vpop.f32.mrf.mxu0 }
 0x28b   : > { %v1279_v33 = vmax.f32 %v1269_v13, 0.0  ;;  %v1354_v35 = vmax.f32 %v1344_v32, 0.0  ;;  %v1318_v27 = vadd.f32 %v1317_v34, %v2021_v30 }
 0x28c   : > { %1534 = vst [vmem:[%s2005_s14 + $0xa0] sm:$0xff] %v1278_v31 }
 0x28d   : > { %1535 = vst [vmem:[%s2005_s14 + $0xa8] sm:$0xff] %v1279_v33  ;;  %v1355_v36 = vmax.f32 %v1318_v27, 0.0 }
 0x28e   : > { %1551 = vst [vmem:[%s2005_s14 + $0xe8] sm:$0xff] %v1354_v35 }
 0x28f   : > { %v1242_v28 = vpop.f32.mrf.mxu2  ;;  %1552 = vst [vmem:[%s2005_s14 + $0xf0] sm:$0xff] %v1355_v36 }
 0x290   : > { %v1243_v37 = vadd.f32 %v1242_v28, %v2021_v30  ;;  %v1271_v38 = vpop.f32.mrf.mxu3  ;;  %v1346_v20 = vpop.f32.mrf.mxu1 }
 0x291   : > { %v1272_v39 = vadd.f32 %v1271_v38, %v2021_v30  ;;  %v1347_v41 = vadd.f32 %v1346_v20, %v2021_v30 }
 0x292   : > { %v1280_v40 = vmax.f32 %v1243_v37, 0.0 }
 0x293   : > { %v1281_v42 = vmax.f32 %v1272_v39, 0.0  ;;  %v1356_v43 = vmax.f32 %v1347_v41, 0.0 }
 0x294   : > { %1536 = vst [vmem:[%s2005_s14 + $0xb0] sm:$0xff] %v1280_v40 }
 0x295   : > { %1537 = vst [vmem:[%s2005_s14 + $0xb8] sm:$0xff] %v1281_v42 }
 0x296   : > { %1553 = vst [vmem:[%s2005_s14 + $0xf8] sm:$0xff] %v1356_v43 }
 0x297 PF: > { %s17_s24 = sadd.s32 1, %s1609_s24  }
 0x298   : > { %p14_p4 = scmp.ge.s32.totalorder %s17_s24, 4  }
 0x29a   :  { %16 = sbr.rel (!%p14_p4) target bundleno = 1 (0x1), region = 89 }

</bundles_post_ra>
